<compile_context>
chip_gen: v7x
topology: tpu7x:2x2x1
jax: 0.10.0
libtpu: 0.0.40
codegen_flags: <defaults>
</compile_context>

<pallas_src>
import functools

import numpy as np
import jax
import jax.numpy as jnp
from jax.experimental import pallas as pl
from jax.experimental.pallas import tpu as pltpu


# ----------------------------------------------------------------------------
# Static (trace-time) helpers
# ----------------------------------------------------------------------------
@functools.lru_cache(maxsize=None)
def _reflect_masks(H, W, N):
    """Boundary masks over the flattened lane axis l = n*H*W + y*W + w.

    Row 0: w == 0     (left column  -> reflect for dx = -1)
    Row 1: w == W-1   (right column -> reflect for dx = +1)
    Row 2: y == 0     (top row      -> reflect for dy = -1)
    Row 3: y == H-1   (bottom row   -> reflect for dy = +1)
    """
    L = N * H * W
    lane = np.arange(L)
    w = lane % W
    y = (lane // W) % H
    m = np.zeros((4, L), dtype=np.int32)
    m[0] = w == 0
    m[1] = w == W - 1
    m[2] = y == 0
    m[3] = y == H - 1
    return m


# ----------------------------------------------------------------------------
# Fused kernel (single invocation, whole arrays in VMEM).
#   x_ref  : (fin,  L)       input, channels on sublanes, N*H*W on lanes
#   m_ref  : (4,    L)       reflect boundary masks (int32 0/1)
#   w0_ref : (9, fhid, fin)  conv_0 weights, per tap, (Cout, Cin)
#   b0_ref : (fhid, 1)       conv_0 bias
#   w1_ref : (9, fout, fhid) conv_1 weights
#   b1_ref : (fout, 1)       conv_1 bias
#   ws_ref : (fout, fin)     1x1 learned-shortcut weight (transposed)
#   o_ref  : (fout, L)       output
# ----------------------------------------------------------------------------
def _make_fused_kernel(H, W, N, fin, fhid, fout):
    L = N * H * W

    def kernel(x_ref, m_ref, w0_ref, b0_ref, w1_ref, b1_ref, ws_ref, o_ref):
        x = x_ref[...].astype(jnp.float32)            # (fin, L)
        masks = m_ref[...]                            # (4, L) int32
        m_w0 = masks[0:1, :] != 0                     # (1, L) bool masks
        m_wl = masks[1:2, :] != 0
        m_y0 = masks[2:3, :] != 0
        m_yl = masks[3:4, :] != 0

        def taps9(a):
            # 9 reflect-padded 3x3 tap views of `a` built with lane rolls (XLU)
            # + boundary selects (VPU).  pltpu.roll(a, s)[p] == a[(p - s) % L],
            # so roll by L-1 reads a[p+1], roll by 1 reads a[p-1], etc.
            # Rolls only cross row / image boundaries at lanes that the reflect
            # masks patch anyway, so the flat circular roll is safe.
            r_m1 = pltpu.roll(a, L - 1, 1)            # a[p+1]
            r_p1 = pltpu.roll(a, 1, 1)                # a[p-1]
            h = [jnp.where(m_w0, r_m1, r_p1),         # dx = -1 (reflect at w==0)
                 a,                                   # dx =  0
                 jnp.where(m_wl, r_p1, r_m1)]         # dx = +1 (reflect at w==W-1)
            out = [None] * 9                          # tap t = (dy+1)*3 + (dx+1)
            for xi in range(3):                       # xi = dx + 1
                hx = h[xi]
                dn = pltpu.roll(hx, L - W, 1)         # hx[p+W]  (row below)
                up = pltpu.roll(hx, W, 1)             # hx[p-W]  (row above)
                out[0 * 3 + xi] = jnp.where(m_y0, dn, up)   # dy = -1
                out[1 * 3 + xi] = hx                         # dy =  0
                out[2 * 3 + xi] = jnp.where(m_yl, up, dn)   # dy = +1
            return out

        def act_conv3x3(a_in, w_ref_, b_ref_, cout):
            # LeakyReLU(0.2) first, then reflect-pad(1) 3x3 conv + bias.
            a = jnp.where(a_in >= 0, a_in, 0.2 * a_in)
            taps = taps9(a)
            acc = jnp.zeros((cout, L), jnp.float32)
            for t in range(9):   # static unroll: 9 tiny (cout,cin)@(cin,L) matmuls
                acc = acc + jnp.dot(w_ref_[t], taps[t],
                                    preferred_element_type=jnp.float32)
            return acc + b_ref_[...]                  # bias broadcast over lanes

        dx = act_conv3x3(x, w0_ref, b0_ref, fhid)     # conv_0 (stays in vregs)
        dx = act_conv3x3(dx, w1_ref, b1_ref, fout)    # conv_1
        xs = jnp.dot(ws_ref[...], x,
                     preferred_element_type=jnp.float32)    # 1x1 shortcut
        o_ref[...] = (xs + dx).astype(o_ref.dtype)    # lane-dense (fout, 512) store

    return kernel


# ----------------------------------------------------------------------------
# One-time parameter prep (hoisted out of the per-call path).
# Conv weights are HWIO (3,3,Cin,Cout) -> per-tap (Cout,Cin).
# ----------------------------------------------------------------------------
def prepare_params(params):
    w0, b0, w1, b1, ws = params
    fin, fhid = w0.shape[2], w0.shape[3]
    fout = w1.shape[3]
    w0t = jnp.transpose(jnp.reshape(w0, (9, fin, fhid)), (0, 2, 1)).astype(jnp.float32)
    w1t = jnp.transpose(jnp.reshape(w1, (9, fhid, fout)), (0, 2, 1)).astype(jnp.float32)
    b0c = jnp.reshape(b0, (fhid, 1)).astype(jnp.float32)
    b1c = jnp.reshape(b1, (fout, 1)).astype(jnp.float32)
    wsT = jnp.transpose(ws).astype(jnp.float32)                      # (fout, fin)
    return (w0t, b0c, w1t, b1c, wsT)


# ----------------------------------------------------------------------------
# Wrapper: single pallas_call, single grid step, NCHW in / NCHW out.
# ----------------------------------------------------------------------------
@jax.jit
def act_first_res_block(x_nchw, prepped):
    w0t, b0c, w1t, b1c, wsT = prepped
    N, fin, H, W = x_nchw.shape
    fhid = w0t.shape[1]
    fout = w1t.shape[1]
    L = N * H * W

    # Channels on sublanes, batch*spatial on lanes: [c, n*HW + y*W + w].
    x2d = jnp.transpose(x_nchw, (1, 0, 2, 3)).reshape(fin, L)
    masks = jnp.asarray(_reflect_masks(H, W, N))          # constant under jit

    kernel = _make_fused_kernel(H, W, N, fin, fhid, fout)
    out2d = pl.pallas_call(
        kernel,
        out_shape=jax.ShapeDtypeStruct((fout, L), x_nchw.dtype),
    )(x2d, masks, w0t, b0c, w1t, b1c, wsT)

    return jnp.transpose(out2d.reshape(fout, N, H, W), (1, 0, 2, 3))


# ----------------------------------------------------------------------------
# Pure-JAX reference (lax.conv) for correctness checking.
# ----------------------------------------------------------------------------
def reference(x_nchw, params):
    w0, b0, w1, b1, ws = params
    lrelu = lambda v: jnp.where(v >= 0, v, 0.2 * v)
    x = jnp.transpose(x_nchw, (0, 2, 3, 1))
    dn = ("NHWC", "HWIO", "NHWC")

    def conv_act_first(v, w, b):
        vp = jnp.pad(lrelu(v), ((0, 0), (1, 1), (1, 1), (0, 0)), mode="reflect")
        y = jax.lax.conv_general_dilated(vp, w, (1, 1), "VALID",
                                         dimension_numbers=dn)
        return y + b

    dx = conv_act_first(x, w0, b0)
    dx = conv_act_first(dx, w1, b1)
    xs = jax.lax.conv_general_dilated(x, ws.reshape(1, 1, *ws.shape), (1, 1),
                                      "VALID", dimension_numbers=dn)
    out = xs + dx
    return jnp.transpose(out, (0, 3, 1, 2))


if __name__ == "__main__":
    # Config: fin=4, fout=8 -> learned_shortcut, fhid=min(4,8)=4,
    # activation='lrelu', norm='none', reflect pad, activation_first.
    fin, fhid, fout = 4, 4, 8
    N, H, W = 2, 16, 16

    key = jax.random.PRNGKey(0)
    k_x, k_w0, k_b0, k_w1, k_b1, k_ws = jax.random.split(key, 6)

    x = jax.random.normal(k_x, (N, fin, H, W), dtype=jnp.float32)

    # Deterministic synthetic parameters (HWIO layout for conv weights).
    w0 = 0.1 * jax.random.normal(k_w0, (3, 3, fin, fhid), dtype=jnp.float32)
    b0 = 0.1 * jax.random.normal(k_b0, (fhid,), dtype=jnp.float32)
    w1 = 0.1 * jax.random.normal(k_w1, (3, 3, fhid, fout), dtype=jnp.float32)
    b1 = 0.1 * jax.random.normal(k_b1, (fout,), dtype=jnp.float32)
    ws = 0.1 * jax.random.normal(k_ws, (fin, fout), dtype=jnp.float32)

    params = (w0, b0, w1, b1, ws)
    prepped = prepare_params(params)          # one-time weight re-layout

    out = jax.block_until_ready(act_first_res_block(x, prepped))
    ref = jax.block_until_ready(reference(x, params))

    assert out.shape == (N, fout, H, W), out.shape
    assert jnp.allclose(out, ref, atol=1e-3, rtol=1e-3), "mismatch vs reference"

    print("KERNEL_OK")
</pallas_src>

<mosaic_0001>
module attributes {stable_mosaic.version = 11 : i64} {
  func.func @kernel(%arg0: memref<4x512xf32, #tpu.memory_space<vmem>>, %arg1: memref<4x512xi32, #tpu.memory_space<vmem>>, %arg2: memref<9x4x4xf32, #tpu.memory_space<vmem>>, %arg3: memref<4x1xf32, #tpu.memory_space<vmem>>, %arg4: memref<9x8x4xf32, #tpu.memory_space<vmem>>, %arg5: memref<8x1xf32, #tpu.memory_space<vmem>>, %arg6: memref<8x4xf32, #tpu.memory_space<vmem>>, %arg7: memref<8x512xf32, #tpu.memory_space<vmem>>) attributes {dimension_semantics = [], scalar_prefetch = 0 : i64, scratch_operands = 0 : i64, tpu.core_type = #tpu.core_type<tc>} {
    %c0 = arith.constant 0 : index
    %c0_0 = arith.constant 0 : index
    %0 = vector.load %arg0[%c0, %c0_0] : memref<4x512xf32, #tpu.memory_space<vmem>>, vector<4x512xf32>
    %c0_1 = arith.constant 0 : index
    %c0_2 = arith.constant 0 : index
    %1 = vector.load %arg1[%c0_1, %c0_2] : memref<4x512xi32, #tpu.memory_space<vmem>>, vector<4x512xi32>
    %2 = vector.extract_strided_slice %1 {offsets = [0, 0], sizes = [1, 512], strides = [1, 1]} : vector<4x512xi32> to vector<1x512xi32>
    %c0_i32 = arith.constant 0 : i32
    %3 = vector.broadcast %c0_i32 : i32 to vector<1x512xi32>
    %4 = arith.cmpi ne, %2, %3 : vector<1x512xi32>
    %5 = vector.extract_strided_slice %1 {offsets = [1, 0], sizes = [1, 512], strides = [1, 1]} : vector<4x512xi32> to vector<1x512xi32>
    %c0_i32_3 = arith.constant 0 : i32
    %6 = vector.broadcast %c0_i32_3 : i32 to vector<1x512xi32>
    %7 = arith.cmpi ne, %5, %6 : vector<1x512xi32>
    %8 = vector.extract_strided_slice %1 {offsets = [2, 0], sizes = [1, 512], strides = [1, 1]} : vector<4x512xi32> to vector<1x512xi32>
    %c0_i32_4 = arith.constant 0 : i32
    %9 = vector.broadcast %c0_i32_4 : i32 to vector<1x512xi32>
    %10 = arith.cmpi ne, %8, %9 : vector<1x512xi32>
    %11 = vector.extract_strided_slice %1 {offsets = [3, 0], sizes = [1, 512], strides = [1, 1]} : vector<4x512xi32> to vector<1x512xi32>
    %c0_i32_5 = arith.constant 0 : i32
    %12 = vector.broadcast %c0_i32_5 : i32 to vector<1x512xi32>
    %13 = arith.cmpi ne, %11, %12 : vector<1x512xi32>
    %cst = arith.constant 0.000000e+00 : f32
    %14 = vector.broadcast %cst : f32 to vector<4x512xf32>
    %15 = arith.cmpf oge, %0, %14 : vector<4x512xf32>
    %cst_6 = arith.constant 2.000000e-01 : f32
    %16 = vector.broadcast %cst_6 : f32 to vector<4x512xf32>
    %17 = arith.mulf %16, %0 : vector<4x512xf32>
    %18 = arith.select %15, %0, %17 : vector<4x512xi1>, vector<4x512xf32>
    %c511_i32 = arith.constant 511 : i32
    %19 = tpu.dynamic_rotate %18 by %c511_i32 dim 1 : vector<4x512xf32>, i32 -> vector<4x512xf32>
    %c1_i32 = arith.constant 1 : i32
    %20 = tpu.dynamic_rotate %18 by %c1_i32 dim 1 : vector<4x512xf32>, i32 -> vector<4x512xf32>
    %21 = vector.shape_cast %4 : vector<1x512xi1> to vector<1x512xi1>
    %22 = vector.broadcast %21 : vector<1x512xi1> to vector<4x512xi1>
    %23 = arith.select %22, %19, %20 : vector<4x512xi1>, vector<4x512xf32>
    %24 = vector.shape_cast %7 : vector<1x512xi1> to vector<1x512xi1>
    %25 = vector.broadcast %24 : vector<1x512xi1> to vector<4x512xi1>
    %26 = arith.select %25, %20, %19 : vector<4x512xi1>, vector<4x512xf32>
    %c496_i32 = arith.constant 496 : i32
    %27 = tpu.dynamic_rotate %23 by %c496_i32 dim 1 : vector<4x512xf32>, i32 -> vector<4x512xf32>
    %c16_i32 = arith.constant 16 : i32
    %28 = tpu.dynamic_rotate %23 by %c16_i32 dim 1 : vector<4x512xf32>, i32 -> vector<4x512xf32>
    %29 = vector.shape_cast %10 : vector<1x512xi1> to vector<1x512xi1>
    %30 = vector.broadcast %29 : vector<1x512xi1> to vector<4x512xi1>
    %31 = arith.select %30, %27, %28 : vector<4x512xi1>, vector<4x512xf32>
    %32 = vector.shape_cast %13 : vector<1x512xi1> to vector<1x512xi1>
    %33 = vector.broadcast %32 : vector<1x512xi1> to vector<4x512xi1>
    %34 = arith.select %33, %28, %27 : vector<4x512xi1>, vector<4x512xf32>
    %c496_i32_7 = arith.constant 496 : i32
    %35 = tpu.dynamic_rotate %18 by %c496_i32_7 dim 1 : vector<4x512xf32>, i32 -> vector<4x512xf32>
    %c16_i32_8 = arith.constant 16 : i32
    %36 = tpu.dynamic_rotate %18 by %c16_i32_8 dim 1 : vector<4x512xf32>, i32 -> vector<4x512xf32>
    %37 = vector.shape_cast %10 : vector<1x512xi1> to vector<1x512xi1>
    %38 = vector.broadcast %37 : vector<1x512xi1> to vector<4x512xi1>
    %39 = arith.select %38, %35, %36 : vector<4x512xi1>, vector<4x512xf32>
    %40 = vector.shape_cast %13 : vector<1x512xi1> to vector<1x512xi1>
    %41 = vector.broadcast %40 : vector<1x512xi1> to vector<4x512xi1>
    %42 = arith.select %41, %36, %35 : vector<4x512xi1>, vector<4x512xf32>
    %c496_i32_9 = arith.constant 496 : i32
    %43 = tpu.dynamic_rotate %26 by %c496_i32_9 dim 1 : vector<4x512xf32>, i32 -> vector<4x512xf32>
    %c16_i32_10 = arith.constant 16 : i32
    %44 = tpu.dynamic_rotate %26 by %c16_i32_10 dim 1 : vector<4x512xf32>, i32 -> vector<4x512xf32>
    %45 = vector.shape_cast %10 : vector<1x512xi1> to vector<1x512xi1>
    %46 = vector.broadcast %45 : vector<1x512xi1> to vector<4x512xi1>
    %47 = arith.select %46, %43, %44 : vector<4x512xi1>, vector<4x512xf32>
    %48 = vector.shape_cast %13 : vector<1x512xi1> to vector<1x512xi1>
    %49 = vector.broadcast %48 : vector<1x512xi1> to vector<4x512xi1>
    %50 = arith.select %49, %44, %43 : vector<4x512xi1>, vector<4x512xf32>
    %cst_11 = arith.constant 0.000000e+00 : f32
    %51 = vector.broadcast %cst_11 : f32 to vector<4x512xf32>
    %c0_12 = arith.constant 0 : index
    %c0_13 = arith.constant 0 : index
    %c0_14 = arith.constant 0 : index
    %52 = vector.load %arg2[%c0_12, %c0_13, %c0_14] : memref<9x4x4xf32, #tpu.memory_space<vmem>>, vector<1x4x4xf32>
    %53 = vector.shape_cast %52 : vector<1x4x4xf32> to vector<4x4xf32>
    %cst_15 = arith.constant dense<0.000000e+00> : vector<4x512xf32>
    %54 = tpu.matmul %53, %31, %cst_15 {dimension_numbers = #tpu.dot_dimension_numbers<[1], [0], [0], [1], [0, 0, 1, 1], [], []>} : vector<4x4xf32>, vector<4x512xf32>, vector<4x512xf32> -> vector<4x512xf32>
    %55 = arith.addf %51, %54 : vector<4x512xf32>
    %c1 = arith.constant 1 : index
    %c0_16 = arith.constant 0 : index
    %c0_17 = arith.constant 0 : index
    %56 = vector.load %arg2[%c1, %c0_16, %c0_17] : memref<9x4x4xf32, #tpu.memory_space<vmem>>, vector<1x4x4xf32>
    %57 = vector.shape_cast %56 : vector<1x4x4xf32> to vector<4x4xf32>
    %cst_18 = arith.constant dense<0.000000e+00> : vector<4x512xf32>
    %58 = tpu.matmul %57, %39, %cst_18 {dimension_numbers = #tpu.dot_dimension_numbers<[1], [0], [0], [1], [0, 0, 1, 1], [], []>} : vector<4x4xf32>, vector<4x512xf32>, vector<4x512xf32> -> vector<4x512xf32>
    %59 = arith.addf %55, %58 : vector<4x512xf32>
    %c2 = arith.constant 2 : index
    %c0_19 = arith.constant 0 : index
    %c0_20 = arith.constant 0 : index
    %60 = vector.load %arg2[%c2, %c0_19, %c0_20] : memref<9x4x4xf32, #tpu.memory_space<vmem>>, vector<1x4x4xf32>
    %61 = vector.shape_cast %60 : vector<1x4x4xf32> to vector<4x4xf32>
    %cst_21 = arith.constant dense<0.000000e+00> : vector<4x512xf32>
    %62 = tpu.matmul %61, %47, %cst_21 {dimension_numbers = #tpu.dot_dimension_numbers<[1], [0], [0], [1], [0, 0, 1, 1], [], []>} : vector<4x4xf32>, vector<4x512xf32>, vector<4x512xf32> -> vector<4x512xf32>
    %63 = arith.addf %59, %62 : vector<4x512xf32>
    %c3 = arith.constant 3 : index
    %c0_22 = arith.constant 0 : index
    %c0_23 = arith.constant 0 : index
    %64 = vector.load %arg2[%c3, %c0_22, %c0_23] : memref<9x4x4xf32, #tpu.memory_space<vmem>>, vector<1x4x4xf32>
    %65 = vector.shape_cast %64 : vector<1x4x4xf32> to vector<4x4xf32>
    %cst_24 = arith.constant dense<0.000000e+00> : vector<4x512xf32>
    %66 = tpu.matmul %65, %23, %cst_24 {dimension_numbers = #tpu.dot_dimension_numbers<[1], [0], [0], [1], [0, 0, 1, 1], [], []>} : vector<4x4xf32>, vector<4x512xf32>, vector<4x512xf32> -> vector<4x512xf32>
    %67 = arith.addf %63, %66 : vector<4x512xf32>
    %c4 = arith.constant 4 : index
    %c0_25 = arith.constant 0 : index
    %c0_26 = arith.constant 0 : index
    %68 = vector.load %arg2[%c4, %c0_25, %c0_26] : memref<9x4x4xf32, #tpu.memory_space<vmem>>, vector<1x4x4xf32>
    %69 = vector.shape_cast %68 : vector<1x4x4xf32> to vector<4x4xf32>
    %cst_27 = arith.constant dense<0.000000e+00> : vector<4x512xf32>
    %70 = tpu.matmul %69, %18, %cst_27 {dimension_numbers = #tpu.dot_dimension_numbers<[1], [0], [0], [1], [0, 0, 1, 1], [], []>} : vector<4x4xf32>, vector<4x512xf32>, vector<4x512xf32> -> vector<4x512xf32>
    %71 = arith.addf %67, %70 : vector<4x512xf32>
    %c5 = arith.constant 5 : index
    %c0_28 = arith.constant 0 : index
    %c0_29 = arith.constant 0 : index
    %72 = vector.load %arg2[%c5, %c0_28, %c0_29] : memref<9x4x4xf32, #tpu.memory_space<vmem>>, vector<1x4x4xf32>
    %73 = vector.shape_cast %72 : vector<1x4x4xf32> to vector<4x4xf32>
    %cst_30 = arith.constant dense<0.000000e+00> : vector<4x512xf32>
    %74 = tpu.matmul %73, %26, %cst_30 {dimension_numbers = #tpu.dot_dimension_numbers<[1], [0], [0], [1], [0, 0, 1, 1], [], []>} : vector<4x4xf32>, vector<4x512xf32>, vector<4x512xf32> -> vector<4x512xf32>
    %75 = arith.addf %71, %74 : vector<4x512xf32>
    %c6 = arith.constant 6 : index
    %c0_31 = arith.constant 0 : index
    %c0_32 = arith.constant 0 : index
    %76 = vector.load %arg2[%c6, %c0_31, %c0_32] : memref<9x4x4xf32, #tpu.memory_space<vmem>>, vector<1x4x4xf32>
    %77 = vector.shape_cast %76 : vector<1x4x4xf32> to vector<4x4xf32>
    %cst_33 = arith.constant dense<0.000000e+00> : vector<4x512xf32>
    %78 = tpu.matmul %77, %34, %cst_33 {dimension_numbers = #tpu.dot_dimension_numbers<[1], [0], [0], [1], [0, 0, 1, 1], [], []>} : vector<4x4xf32>, vector<4x512xf32>, vector<4x512xf32> -> vector<4x512xf32>
    %79 = arith.addf %75, %78 : vector<4x512xf32>
    %c7 = arith.constant 7 : index
    %c0_34 = arith.constant 0 : index
    %c0_35 = arith.constant 0 : index
    %80 = vector.load %arg2[%c7, %c0_34, %c0_35] : memref<9x4x4xf32, #tpu.memory_space<vmem>>, vector<1x4x4xf32>
    %81 = vector.shape_cast %80 : vector<1x4x4xf32> to vector<4x4xf32>
    %cst_36 = arith.constant dense<0.000000e+00> : vector<4x512xf32>
    %82 = tpu.matmul %81, %42, %cst_36 {dimension_numbers = #tpu.dot_dimension_numbers<[1], [0], [0], [1], [0, 0, 1, 1], [], []>} : vector<4x4xf32>, vector<4x512xf32>, vector<4x512xf32> -> vector<4x512xf32>
    %83 = arith.addf %79, %82 : vector<4x512xf32>
    %c8 = arith.constant 8 : index
    %c0_37 = arith.constant 0 : index
    %c0_38 = arith.constant 0 : index
    %84 = vector.load %arg2[%c8, %c0_37, %c0_38] : memref<9x4x4xf32, #tpu.memory_space<vmem>>, vector<1x4x4xf32>
    %85 = vector.shape_cast %84 : vector<1x4x4xf32> to vector<4x4xf32>
    %cst_39 = arith.constant dense<0.000000e+00> : vector<4x512xf32>
    %86 = tpu.matmul %85, %50, %cst_39 {dimension_numbers = #tpu.dot_dimension_numbers<[1], [0], [0], [1], [0, 0, 1, 1], [], []>} : vector<4x4xf32>, vector<4x512xf32>, vector<4x512xf32> -> vector<4x512xf32>
    %87 = arith.addf %83, %86 : vector<4x512xf32>
    %c0_40 = arith.constant 0 : index
    %c0_41 = arith.constant 0 : index
    %88 = vector.load %arg3[%c0_40, %c0_41] : memref<4x1xf32, #tpu.memory_space<vmem>>, vector<4x1xf32>
    %89 = vector.broadcast %88 : vector<4x1xf32> to vector<4x512xf32>
    %90 = arith.addf %87, %89 : vector<4x512xf32>
    %cst_42 = arith.constant 0.000000e+00 : f32
    %91 = vector.broadcast %cst_42 : f32 to vector<4x512xf32>
    %92 = arith.cmpf oge, %90, %91 : vector<4x512xf32>
    %cst_43 = arith.constant 2.000000e-01 : f32
    %93 = vector.broadcast %cst_43 : f32 to vector<4x512xf32>
    %94 = arith.mulf %93, %90 : vector<4x512xf32>
    %95 = arith.select %92, %90, %94 : vector<4x512xi1>, vector<4x512xf32>
    %c511_i32_44 = arith.constant 511 : i32
    %96 = tpu.dynamic_rotate %95 by %c511_i32_44 dim 1 : vector<4x512xf32>, i32 -> vector<4x512xf32>
    %c1_i32_45 = arith.constant 1 : i32
    %97 = tpu.dynamic_rotate %95 by %c1_i32_45 dim 1 : vector<4x512xf32>, i32 -> vector<4x512xf32>
    %98 = vector.shape_cast %4 : vector<1x512xi1> to vector<1x512xi1>
    %99 = vector.broadcast %98 : vector<1x512xi1> to vector<4x512xi1>
    %100 = arith.select %99, %96, %97 : vector<4x512xi1>, vector<4x512xf32>
    %101 = vector.shape_cast %7 : vector<1x512xi1> to vector<1x512xi1>
    %102 = vector.broadcast %101 : vector<1x512xi1> to vector<4x512xi1>
    %103 = arith.select %102, %97, %96 : vector<4x512xi1>, vector<4x512xf32>
    %c496_i32_46 = arith.constant 496 : i32
    %104 = tpu.dynamic_rotate %100 by %c496_i32_46 dim 1 : vector<4x512xf32>, i32 -> vector<4x512xf32>
    %c16_i32_47 = arith.constant 16 : i32
    %105 = tpu.dynamic_rotate %100 by %c16_i32_47 dim 1 : vector<4x512xf32>, i32 -> vector<4x512xf32>
    %106 = vector.shape_cast %10 : vector<1x512xi1> to vector<1x512xi1>
    %107 = vector.broadcast %106 : vector<1x512xi1> to vector<4x512xi1>
    %108 = arith.select %107, %104, %105 : vector<4x512xi1>, vector<4x512xf32>
    %109 = vector.shape_cast %13 : vector<1x512xi1> to vector<1x512xi1>
    %110 = vector.broadcast %109 : vector<1x512xi1> to vector<4x512xi1>
    %111 = arith.select %110, %105, %104 : vector<4x512xi1>, vector<4x512xf32>
    %c496_i32_48 = arith.constant 496 : i32
    %112 = tpu.dynamic_rotate %95 by %c496_i32_48 dim 1 : vector<4x512xf32>, i32 -> vector<4x512xf32>
    %c16_i32_49 = arith.constant 16 : i32
    %113 = tpu.dynamic_rotate %95 by %c16_i32_49 dim 1 : vector<4x512xf32>, i32 -> vector<4x512xf32>
    %114 = vector.shape_cast %10 : vector<1x512xi1> to vector<1x512xi1>
    %115 = vector.broadcast %114 : vector<1x512xi1> to vector<4x512xi1>
    %116 = arith.select %115, %112, %113 : vector<4x512xi1>, vector<4x512xf32>
    %117 = vector.shape_cast %13 : vector<1x512xi1> to vector<1x512xi1>
    %118 = vector.broadcast %117 : vector<1x512xi1> to vector<4x512xi1>
    %119 = arith.select %118, %113, %112 : vector<4x512xi1>, vector<4x512xf32>
    %c496_i32_50 = arith.constant 496 : i32
    %120 = tpu.dynamic_rotate %103 by %c496_i32_50 dim 1 : vector<4x512xf32>, i32 -> vector<4x512xf32>
    %c16_i32_51 = arith.constant 16 : i32
    %121 = tpu.dynamic_rotate %103 by %c16_i32_51 dim 1 : vector<4x512xf32>, i32 -> vector<4x512xf32>
    %122 = vector.shape_cast %10 : vector<1x512xi1> to vector<1x512xi1>
    %123 = vector.broadcast %122 : vector<1x512xi1> to vector<4x512xi1>
    %124 = arith.select %123, %120, %121 : vector<4x512xi1>, vector<4x512xf32>
    %125 = vector.shape_cast %13 : vector<1x512xi1> to vector<1x512xi1>
    %126 = vector.broadcast %125 : vector<1x512xi1> to vector<4x512xi1>
    %127 = arith.select %126, %121, %120 : vector<4x512xi1>, vector<4x512xf32>
    %cst_52 = arith.constant 0.000000e+00 : f32
    %128 = vector.broadcast %cst_52 : f32 to vector<8x512xf32>
    %c0_53 = arith.constant 0 : index
    %c0_54 = arith.constant 0 : index
    %c0_55 = arith.constant 0 : index
    %129 = vector.load %arg4[%c0_53, %c0_54, %c0_55] : memref<9x8x4xf32, #tpu.memory_space<vmem>>, vector<1x8x4xf32>
    %130 = vector.shape_cast %129 : vector<1x8x4xf32> to vector<8x4xf32>
    %cst_56 = arith.constant dense<0.000000e+00> : vector<8x512xf32>
    %131 = tpu.matmul %130, %108, %cst_56 {dimension_numbers = #tpu.dot_dimension_numbers<[1], [0], [0], [1], [0, 0, 1, 1], [], []>} : vector<8x4xf32>, vector<4x512xf32>, vector<8x512xf32> -> vector<8x512xf32>
    %132 = arith.addf %128, %131 : vector<8x512xf32>
    %c1_57 = arith.constant 1 : index
    %c0_58 = arith.constant 0 : index
    %c0_59 = arith.constant 0 : index
    %133 = vector.load %arg4[%c1_57, %c0_58, %c0_59] : memref<9x8x4xf32, #tpu.memory_space<vmem>>, vector<1x8x4xf32>
    %134 = vector.shape_cast %133 : vector<1x8x4xf32> to vector<8x4xf32>
    %cst_60 = arith.constant dense<0.000000e+00> : vector<8x512xf32>
    %135 = tpu.matmul %134, %116, %cst_60 {dimension_numbers = #tpu.dot_dimension_numbers<[1], [0], [0], [1], [0, 0, 1, 1], [], []>} : vector<8x4xf32>, vector<4x512xf32>, vector<8x512xf32> -> vector<8x512xf32>
    %136 = arith.addf %132, %135 : vector<8x512xf32>
    %c2_61 = arith.constant 2 : index
    %c0_62 = arith.constant 0 : index
    %c0_63 = arith.constant 0 : index
    %137 = vector.load %arg4[%c2_61, %c0_62, %c0_63] : memref<9x8x4xf32, #tpu.memory_space<vmem>>, vector<1x8x4xf32>
    %138 = vector.shape_cast %137 : vector<1x8x4xf32> to vector<8x4xf32>
    %cst_64 = arith.constant dense<0.000000e+00> : vector<8x512xf32>
    %139 = tpu.matmul %138, %124, %cst_64 {dimension_numbers = #tpu.dot_dimension_numbers<[1], [0], [0], [1], [0, 0, 1, 1], [], []>} : vector<8x4xf32>, vector<4x512xf32>, vector<8x512xf32> -> vector<8x512xf32>
    %140 = arith.addf %136, %139 : vector<8x512xf32>
    %c3_65 = arith.constant 3 : index
    %c0_66 = arith.constant 0 : index
    %c0_67 = arith.constant 0 : index
    %141 = vector.load %arg4[%c3_65, %c0_66, %c0_67] : memref<9x8x4xf32, #tpu.memory_space<vmem>>, vector<1x8x4xf32>
    %142 = vector.shape_cast %141 : vector<1x8x4xf32> to vector<8x4xf32>
    %cst_68 = arith.constant dense<0.000000e+00> : vector<8x512xf32>
    %143 = tpu.matmul %142, %100, %cst_68 {dimension_numbers = #tpu.dot_dimension_numbers<[1], [0], [0], [1], [0, 0, 1, 1], [], []>} : vector<8x4xf32>, vector<4x512xf32>, vector<8x512xf32> -> vector<8x512xf32>
    %144 = arith.addf %140, %143 : vector<8x512xf32>
    %c4_69 = arith.constant 4 : index
    %c0_70 = arith.constant 0 : index
    %c0_71 = arith.constant 0 : index
    %145 = vector.load %arg4[%c4_69, %c0_70, %c0_71] : memref<9x8x4xf32, #tpu.memory_space<vmem>>, vector<1x8x4xf32>
    %146 = vector.shape_cast %145 : vector<1x8x4xf32> to vector<8x4xf32>
    %cst_72 = arith.constant dense<0.000000e+00> : vector<8x512xf32>
    %147 = tpu.matmul %146, %95, %cst_72 {dimension_numbers = #tpu.dot_dimension_numbers<[1], [0], [0], [1], [0, 0, 1, 1], [], []>} : vector<8x4xf32>, vector<4x512xf32>, vector<8x512xf32> -> vector<8x512xf32>
    %148 = arith.addf %144, %147 : vector<8x512xf32>
    %c5_73 = arith.constant 5 : index
    %c0_74 = arith.constant 0 : index
    %c0_75 = arith.constant 0 : index
    %149 = vector.load %arg4[%c5_73, %c0_74, %c0_75] : memref<9x8x4xf32, #tpu.memory_space<vmem>>, vector<1x8x4xf32>
    %150 = vector.shape_cast %149 : vector<1x8x4xf32> to vector<8x4xf32>
    %cst_76 = arith.constant dense<0.000000e+00> : vector<8x512xf32>
    %151 = tpu.matmul %150, %103, %cst_76 {dimension_numbers = #tpu.dot_dimension_numbers<[1], [0], [0], [1], [0, 0, 1, 1], [], []>} : vector<8x4xf32>, vector<4x512xf32>, vector<8x512xf32> -> vector<8x512xf32>
    %152 = arith.addf %148, %151 : vector<8x512xf32>
    %c6_77 = arith.constant 6 : index
    %c0_78 = arith.constant 0 : index
    %c0_79 = arith.constant 0 : index
    %153 = vector.load %arg4[%c6_77, %c0_78, %c0_79] : memref<9x8x4xf32, #tpu.memory_space<vmem>>, vector<1x8x4xf32>
    %154 = vector.shape_cast %153 : vector<1x8x4xf32> to vector<8x4xf32>
    %cst_80 = arith.constant dense<0.000000e+00> : vector<8x512xf32>
    %155 = tpu.matmul %154, %111, %cst_80 {dimension_numbers = #tpu.dot_dimension_numbers<[1], [0], [0], [1], [0, 0, 1, 1], [], []>} : vector<8x4xf32>, vector<4x512xf32>, vector<8x512xf32> -> vector<8x512xf32>
    %156 = arith.addf %152, %155 : vector<8x512xf32>
    %c7_81 = arith.constant 7 : index
    %c0_82 = arith.constant 0 : index
    %c0_83 = arith.constant 0 : index
    %157 = vector.load %arg4[%c7_81, %c0_82, %c0_83] : memref<9x8x4xf32, #tpu.memory_space<vmem>>, vector<1x8x4xf32>
    %158 = vector.shape_cast %157 : vector<1x8x4xf32> to vector<8x4xf32>
    %cst_84 = arith.constant dense<0.000000e+00> : vector<8x512xf32>
    %159 = tpu.matmul %158, %119, %cst_84 {dimension_numbers = #tpu.dot_dimension_numbers<[1], [0], [0], [1], [0, 0, 1, 1], [], []>} : vector<8x4xf32>, vector<4x512xf32>, vector<8x512xf32> -> vector<8x512xf32>
    %160 = arith.addf %156, %159 : vector<8x512xf32>
    %c8_85 = arith.constant 8 : index
    %c0_86 = arith.constant 0 : index
    %c0_87 = arith.constant 0 : index
    %161 = vector.load %arg4[%c8_85, %c0_86, %c0_87] : memref<9x8x4xf32, #tpu.memory_space<vmem>>, vector<1x8x4xf32>
    %162 = vector.shape_cast %161 : vector<1x8x4xf32> to vector<8x4xf32>
    %cst_88 = arith.constant dense<0.000000e+00> : vector<8x512xf32>
    %163 = tpu.matmul %162, %127, %cst_88 {dimension_numbers = #tpu.dot_dimension_numbers<[1], [0], [0], [1], [0, 0, 1, 1], [], []>} : vector<8x4xf32>, vector<4x512xf32>, vector<8x512xf32> -> vector<8x512xf32>
    %164 = arith.addf %160, %163 : vector<8x512xf32>
    %c0_89 = arith.constant 0 : index
    %c0_90 = arith.constant 0 : index
    %165 = vector.load %arg5[%c0_89, %c0_90] : memref<8x1xf32, #tpu.memory_space<vmem>>, vector<8x1xf32>
    %166 = vector.broadcast %165 : vector<8x1xf32> to vector<8x512xf32>
    %167 = arith.addf %164, %166 : vector<8x512xf32>
    %c0_91 = arith.constant 0 : index
    %c0_92 = arith.constant 0 : index
    %168 = vector.load %arg6[%c0_91, %c0_92] : memref<8x4xf32, #tpu.memory_space<vmem>>, vector<8x4xf32>
    %cst_93 = arith.constant dense<0.000000e+00> : vector<8x512xf32>
    %169 = tpu.matmul %168, %0, %cst_93 {dimension_numbers = #tpu.dot_dimension_numbers<[1], [0], [0], [1], [0, 0, 1, 1], [], []>} : vector<8x4xf32>, vector<4x512xf32>, vector<8x512xf32> -> vector<8x512xf32>
    %170 = arith.addf %169, %167 : vector<8x512xf32>
    %c0_94 = arith.constant 0 : index
    %c0_95 = arith.constant 0 : index
    %171 = vector.load %arg7[%c0_94, %c0_95] : memref<8x512xf32, #tpu.memory_space<vmem>>, vector<8x512xf32>
    tpu.vector_store %arg7[%c0_94, %c0_95], %170 {strides = array<i32>} : memref<8x512xf32, #tpu.memory_space<vmem>>, vector<8x512xf32>,
    return
  }
}

</mosaic_0001>

<bundles_post_ra>
// kernel: act_first_res_block.1
= control target key start
LH: loop header
LB: loop body
LE: loop exit
PB: predicated region body
PF: predicated region fallthrough
CT: control target
= control target key end

     0   :  { %v3777_v2 = vmov 0   ;;  %s3778_s28 = smov 127   ;;  %s3779_s29 = smov 1   ;;  %v52_v9 = vlaneseq  ;;  %v3782_v45 = vmov 0.0   ;;  %s4852_s0 = inlined_call_operand.vmem [shape: f32[4,512], index: 0, kind: input, shape index: {}]   ;;  %s4853_s1 = inlined_call_operand.vmem [shape: s32[4,512], index: 1, kind: input, shape index: {}]   ;;  %s4854_s2 = inlined_call_operand.vmem [shape: f32[9,4,4], index: 2, kind: input, shape index: {}]   ;;  %s4855_s3 = inlined_call_operand.vmem [shape: f32[4,1], index: 3, kind: input, shape index: {}]   ;;  %s4856_s4 = inlined_call_operand.vmem [shape: f32[9,8,4], index: 4, kind: input, shape index: {}]   ;;  %s4857_s5 = inlined_call_operand.vmem [shape: f32[8,1], index: 5, kind: input, shape index: {}]   ;;  %s4858_s6 = inlined_call_operand.vmem [shape: f32[8,4], index: 6, kind: input, shape index: {}]   ;;  %s4859_s7 = inlined_call_operand.vmem [shape: f32[8,512], index: 7, kind: output, shape index: {}]  }
   0x1   :  { %v27_v0 = vld [vmem:[%s4852_s0 + $0x8] sm:$0xff]  ;;  %v26_v1 = vld [vmem:[%s4852_s0] sm:$0xff]  ;;  %3772 = vset.pattern.permute.xlu0 %v3777_v2  ;;  %s3780_s30 = smov 112   ;;  %s3781_s8 = smov 16   ;;  %408 = vmatprep.mubr.f32.mxu0 %v3782_v45 }
   0x2   :  { %vm33_vm0 = vcmp.ge.f32.partialorder %v27_v0, 0.0  ;;  %v35_v3 = vmul.f32 0.2, %v27_v0  ;;  %vm32_vm1 = vcmp.ge.f32.partialorder %v26_v1, 0.0  ;;  %v34_v4 = vmul.f32 0.2, %v26_v1  ;;  %479 = vmatprep.mubr.f32.mxu1 %v3782_v45 }
   0x3   :  { %v28_v10 = vld [vmem:[%s4853_s1] sm:$0xff]  ;;  %v3876_v11 = vshrl.u32 %v52_v9, 7  ;;  %v29_v12 = vld [vmem:[%s4853_s1 + $0x8] sm:$0xff]  ;;  %v3888_v20 = vand.u32 127, %v52_v9 }
   0x4   :  { %v3829_v5 = vsel %vm33_vm0, %v27_v0, %v35_v3  ;;  %v3831_v6 = vsel %vm32_vm1, %v26_v1, %v34_v4  ;;  %vm30_vm2 = vcmp.ne.s32.totalorder %v28_v10, 0  ;;  %vm31_vm3 = vcmp.ne.s32.totalorder %v29_v12, 0 }
   0x5   :  { %48 = vrot.lane.b32.xlu1 %v3829_v5, %s3778_s28  ;;  %44 = vrot.lane.b32.xlu0 %v3831_v6, %s3778_s28  ;;  %v3839_v7 = vcombine.high %v3829_v5, %v3829_v5  ;;  %v3843_v8 = vcombine.high %v3831_v6, %v3831_v6  ;;  %v80_v13 = vsub.s32 4, %v3876_v11  ;;  %v3882_v14 = vsel %vm30_vm2, 1, %v3777_v2 }
   0x6   :  { %v76_v15 = vsub.s32 0, %v3876_v11  ;;  %v3886_v19 = vsel %vm31_vm3, 1, %v3777_v2  ;;  %vm4863_vm4 = vcmp.lt.s32.totalorder %v3888_v20, 127  ;;  %vm4862_vm5 = vcmp.lt.s32.totalorder %v3888_v20, 1 }
   0x7   :  { %v81_v16 = vrot.slane %v3882_v14, %v80_v13  ;;  %v89_v23 = vrot.slane %v3886_v19, %v80_v13  ;;  %v120_v36 = vsub.s32 5, %v3876_v11  ;;  %v186_v38 = vsub.s32 6, %v3876_v11 }
   0x8   :  { %v77_v21 = vrot.slane %v3882_v14, %v76_v15  ;;  %v85_v27 = vrot.slane %v3886_v19, %v76_v15  ;;  %v226_v39 = vsub.s32 7, %v3876_v11  ;;  %v116_v42 = vsub.s32 1, %v3876_v11 }
   0x9   :  { %50 = vrot.lane.b32.xlu1 %v3839_v7, %s3778_s28  ;;  %46 = vrot.lane.b32.xlu0 %v3843_v8, %s3778_s28  ;;  %v97_v22 = vrot.slane %v81_v16, %v76_v15  ;;  %v105_v29 = vrot.slane %v89_v23, %v76_v15  ;;  %v3929_v43 = vsub.s32 3, %v3876_v11  ;;  %v3932_v44 = vsub.s32 2, %v3876_v11 }
   0xa   :  { %v3894_v26 = vrot.slane %v77_v21, %v76_v15  ;;  %v3916_v35 = vrot.slane %v85_v27, %v76_v15  ;;  %v121_v52 = vrot.slane %v3882_v14, %v120_v36  ;;  %v117_v53 = vrot.slane %v3882_v14, %v116_v42 }
   0xb   :  { %vm3897_vm6 = vcmp.eq.s32.totalorder %v97_v22, 1  ;;  %vm3921_vm8 = vcmp.eq.s32.totalorder %v105_v29, 1  ;;  %v187_v55 = vrot.slane %v3882_v14, %v186_v38  ;;  %v227_v56 = vrot.slane %v3882_v14, %v226_v39 }
   0xc   :  { %vm4861_vm7 = vcmp.eq.s32.totalorder %v3894_v26, 1  ;;  %vm4860_vm9 = vcmp.eq.s32.totalorder %v3916_v35, 1  ;;  %v129_v57 = vrot.slane %v3886_v19, %v120_v36  ;;  %v223_v61 = vrot.slane %v3882_v14, %v3929_v43 }
   0xd   :  { %61 = vrot.lane.b32.xlu1 %v3843_v8, %s3779_s29  ;;  %59 = vrot.lane.b32.xlu0 %v3831_v6, %s3779_s29  ;;  %v183_v62 = vrot.slane %v3882_v14, %v3932_v44  ;;  %v137_v0 = vrot.slane %v121_v52, %v116_v42  ;;  %v3992_v1 = vrot.slane %v117_v53, %v116_v42  ;;  %vm162_vm10 = vcmp.lt.s32.totalorder %v3888_v20, 112 }
   0xe   :  { %v231_v2 = vrot.slane %v3886_v19, %v3929_v43  ;;  %v203_v3 = vrot.slane %v187_v55, %v3932_v44  ;;  %v195_v4 = vrot.slane %v3886_v19, %v186_v38  ;;  %v243_v9 = vrot.slane %v227_v56, %v3929_v43  ;;  %v3776_v55 = vld [vmem:[%s4852_s0 + $0x8] sm:$0xff] }
   0xf   :  { %v145_v10 = vrot.slane %v129_v57, %v116_v42  ;;  %v125_v11 = vrot.slane %v3886_v19, %v116_v42  ;;  %v191_v14 = vrot.slane %v3886_v19, %v3932_v44  ;;  %v235_v15 = vrot.slane %v3886_v19, %v226_v39 }
  0x10   :  { %v4009_v16 = vrot.slane %v223_v61, %v3929_v43  ;;  %vm175_vm11 = vcmp.lt.s32.totalorder %v3888_v20, 16  ;;  %vm4015_vm12 = vcmp.eq.s32.totalorder %v137_v0, 1  ;;  %vm4864_vm13 = vcmp.eq.s32.totalorder %v3992_v1, 1  ;;  %v3564_v61 = vld [vmem:[%s4854_s2 + $0x4] sm:$0xf] }
  0x11   :  { %65 = vrot.lane.b32.xlu1 %v3839_v7, %s3779_s29  ;;  %63 = vrot.lane.b32.xlu0 %v3829_v5, %s3779_s29  ;;  %v4021_v21 = vrot.slane %v231_v2, %v3929_v43  ;;  %vm4031_vm14 = vcmp.eq.s32.totalorder %v203_v3, 1  ;;  %v211_v23 = vrot.slane %v195_v4, %v3932_v44  ;;  %vm4036_vm15 = vcmp.eq.s32.totalorder %v243_v9, 1 }
  0x12   :  { %vm4040_vm0 = vcmp.eq.s32.totalorder %v145_v10, 1  ;;  %v4044_v27 = vrot.slane %v125_v11, %v116_v42  ;;  %v251_v36 = vrot.slane %v235_v15, %v3929_v43  ;;  %vm4865_vm1 = vcmp.eq.s32.totalorder %v4009_v16, 1 }
  0x13   :  { %vm331_vm2 = vcmask 1043456  }
  0x15   :  { %262 = vrot.lane.b32.xlu1 %v3843_v8, %s3780_s30  ;;  %260 = vrot.lane.b32.xlu0 %v3831_v6, %s3780_s30 }
  0x19   :  { %266 = vrot.lane.b32.xlu1 %v3839_v7, %s3780_s30  ;;  %264 = vrot.lane.b32.xlu0 %v3829_v5, %s3780_s30 }
  0x1d   :  { %274 = vrot.lane.b32.xlu1 %v3843_v8, %s3781_s8  ;;  %272 = vrot.lane.b32.xlu0 %v3831_v6, %s3781_s8 }
  0x21   :  { %278 = vrot.lane.b32.xlu1 %v3839_v7, %s3781_s8  ;;  %276 = vrot.lane.b32.xlu0 %v3829_v5, %s3781_s8 }
  0x77   :  { %v49_v17 = vpop.permute.xlu1 %48  ;;  %v45_v18 = vpop.permute.xlu0 %44 }
  0x7b   :  { %v51_v24 = vpop.permute.xlu1 %50  ;;  %v47_v25 = vpop.permute.xlu0 %46 }
  0x7c   :  { %v3903_v32 = vsel %vm4863_vm4, %v47_v25, %v49_v17  ;;  %v3938_v46 = vsel %vm4863_vm4, %v51_v24, %v45_v18  ;;  %v3942_v47 = vsel %vm4863_vm4, %v45_v18, %v47_v25  ;;  %v3980_v60 = vsel %vm4863_vm4, %v49_v17, %v51_v24  ;;  %v3775_v24 = vld [vmem:[%s4852_s0] sm:$0xff] }
  0x7d   :  { %v4012_v17 = vrot.slane %v183_v62, %v3932_v44  ;;  %vm4867_vm4 = vcmask 31744  }
  0x7f   :  { %v62_v30 = vpop.permute.xlu1 %61  ;;  %v60_v31 = vpop.permute.xlu0 %59  ;;  %vm4869_vm3 = vcmp.eq.s32.totalorder %v4012_v17, 1 }
  0x80   :  { %v3907_v33 = vsel %vm4862_vm5, %v60_v31, %v62_v30 }
  0x81   :  { %v3913_v34 = vsel %vm3897_vm6, %v3903_v32, %v3907_v33  ;;  %v4060_v39 = vsel %vm4015_vm12, %v3907_v33, %v3903_v32 }
  0x82   :  { %156 = vrot.lane.b32.xlu1 %v3913_v34, %s3780_s30 }
  0x83   :  { %v66_v40 = vpop.permute.xlu1 %65  ;;  %v64_v41 = vpop.permute.xlu0 %63 }
  0x84   :  { %v3946_v48 = vsel %vm4862_vm5, %v66_v40, %v60_v31  ;;  %v3950_v49 = vsel %vm4862_vm5, %v64_v41, %v66_v40  ;;  %v3968_v54 = vsel %vm4862_vm5, %v62_v30, %v64_v41  ;;  %v4047_v31 = vrot.slane %v191_v14, %v3932_v44 }
  0x85   :  { %v3956_v50 = vsel %vm4861_vm7, %v3942_v47, %v3946_v48  ;;  %v3962_v51 = vsel %vm3921_vm8, %v3938_v46, %v3950_v49  ;;  %v3990_v63 = vsel %vm4860_vm9, %v3980_v60, %v3968_v54  ;;  %vm4083_vm7 = vcmp.eq.s32.totalorder %v211_v23, 1 }
  0x86   :  { %154 = vrot.lane.b32.xlu0 %v3956_v50, %s3780_s30  ;;  %160 = vrot.lane.b32.xlu1 %v3962_v51, %s3780_s30  ;;  %v4091_v44 = vsel %vm4864_vm13, %v3946_v48, %v3942_v47  ;;  %vm4868_vm5 = vcmp.eq.s32.totalorder %v4047_v31, 1  ;;  %vm4095_vm9 = vcmp.eq.s32.totalorder %v251_v36, 1  ;;  %v4103_v56 = vsel %vm4040_vm0, %v3950_v49, %v3938_v46  ;;  %v324_v36 = vld [vmem:[%s4854_s2] sm:$0xf] }
  0x87   :  { %v263_v58 = vpop.permute.xlu1 %262  ;;  %v261_v59 = vpop.permute.xlu0 %260  ;;  %vm4886_vm13 = vcmp.eq.s32.totalorder %v4021_v21, 1 }
  0x88   :  { %v270_v32 = vsel %vm162_vm10, %v261_v59, %v263_v58 }
  0x8a   :  { %158 = vrot.lane.b32.xlu0 %v3990_v63, %s3780_s30  ;;  %169 = vrot.lane.b32.xlu1 %v3913_v34, %s3781_s8 }
  0x8b   :  { %v267_v12 = vpop.permute.xlu1 %266  ;;  %v265_v13 = vpop.permute.xlu0 %264 }
  0x8c   :  { %v4029_v19 = vsel %vm162_vm10, %v263_v58, %v265_v13  ;;  %v4079_v33 = vsel %vm162_vm10, %v267_v12, %v261_v59  ;;  %v268_v42 = vsel %vm162_vm10, %v265_v13, %v267_v12 }
  0x8e   :  { %167 = vrot.lane.b32.xlu0 %v3956_v50, %s3781_s8  ;;  %173 = vrot.lane.b32.xlu1 %v3962_v51, %s3781_s8 }
  0x8f   :  { %v275_v29 = vpop.permute.xlu1 %274  ;;  %v273_v30 = vpop.permute.xlu0 %272 }
  0x90   :  { %v4052_v38 = vsel %vm175_vm11, %v273_v30, %v275_v29 }
  0x91   :  { %v285_v40 = vsel %vm4031_vm14, %v4029_v19, %v4052_v38  ;;  %v289_v41 = vsel %vm4036_vm15, %v4052_v38, %v4029_v19 }
  0x92   :  { %171 = vrot.lane.b32.xlu0 %v3990_v63, %s3781_s8  ;;  %294 = vrot.lane.b32.xlu1 %v4060_v39, %s3780_s30 }
  0x93   :  { %v279_v52 = vpop.permute.xlu1 %278  ;;  %3565 = vmatprep.subr.msk.mxu0 %vm331_vm2, %v285_v40  ;;  %v277_v53 = vpop.permute.xlu0 %276 }
  0x94   :  { %v283_v47 = vsel %vm175_vm11, %v279_v52, %v273_v30  ;;  %v4109_v48 = vsel %vm175_vm11, %v277_v53, %v279_v52  ;;  %v281_v57 = vsel %vm175_vm11, %v275_v29, %v277_v53 }
  0x95   :  { %v4115_v58 = vsel %vm4865_vm1, %v283_v47, %v270_v32  ;;  %v284_v59 = vsel %vm4869_vm3, %v270_v32, %v283_v47  ;;  %v4121_v46 = vsel %vm4886_vm13, %v281_v57, %v268_v42  ;;  %v287_v49 = vsel %vm4083_vm7, %v4079_v33, %v4109_v48 }
  0x96   :  { %292 = vrot.lane.b32.xlu0 %v4091_v44, %s3780_s30  ;;  %298 = vrot.lane.b32.xlu1 %v4103_v56, %s3780_s30  ;;  %vm4866_vm1 = vcmp.eq.s32.totalorder %v4044_v27, 1  ;;  %v286_v62 = vsel %vm4868_vm5, %v268_v42, %v281_v57  ;;  %v291_v0 = vsel %vm4095_vm9, %v4109_v48, %v4079_v33  ;;  %vm4887_vm13 = vcmp.eq.s32.totalorder %v4009_v16, 1 }
  0x97   :  { %3566 = vmatpush1.msk.msra.mxu0 %vm331_vm2, %v284_v59  ;;  %3568 = vmatprep.subr.msk.mxu1 %vm331_vm2, %v287_v49  ;;  %v4149_v2 = vsel %vm4866_vm1, %v3968_v54, %v3980_v60  ;;  %v1780_v54 = vld [vmem:[%s4855_s3] sm:$0xf]  ;;  %vm4888_vm1 = vcmp.eq.s32.totalorder %v4021_v21, 1 }
  0x98   :  { %3569 = vmatpush1.msk.msra.mxu1 %vm331_vm2, %v286_v62  ;;  %3567 = vmatmul.mubr.msk.f32.vlgmr.msra.gmra.mrb[0].mxu0 %vm4867_vm4, %v3564_v61 }
  0x99   :  { %3570 = vmatmul.mubr.msk.f32.vlgmr.msra.gmra.mrb[0].mxu1 %vm4867_vm4, %v3564_v61  ;;  %565 = vmatprep.mubr.f32.mxu0 %v3782_v45 }
  0x9a   :  { %296 = vrot.lane.b32.xlu0 %v4149_v2, %s3780_s30  ;;  %306 = vrot.lane.b32.xlu1 %v4060_v39, %s3781_s8 }
  0x9b   :  { %636 = vmatprep.mubr.f32.mxu1 %v3782_v45 }
  0x9e   :  { %304 = vrot.lane.b32.xlu0 %v4091_v44, %s3781_s8  ;;  %310 = vrot.lane.b32.xlu1 %v4103_v56, %s3781_s8 }
  0xa2   :  { %308 = vrot.lane.b32.xlu0 %v4149_v2, %s3781_s8 }
  0xa6   :  { %1783 = vperm.xlu0 %3772, %v1780_v54  }
  0xf4   :  { %v157_v60 = vpop.permute.xlu1 %156 }
  0xf8   :  { %v161_v3 = vpop.permute.xlu1 %160  ;;  %v155_v4 = vpop.permute.xlu0 %154 }
  0xf9   :  { %v4169_v13 = vsel %vm162_vm10, %v155_v4, %v157_v60  ;;  %v4198_v42 = vsel %vm162_vm10, %v161_v3, %v155_v4 }
  0xfc   :  { %v170_v9 = vpop.permute.xlu1 %169  ;;  %v159_v10 = vpop.permute.xlu0 %158 }
  0xfd   :  { %v4173_v14 = vsel %vm162_vm10, %v157_v60, %v159_v10  ;;  %v4202_v52 = vsel %vm162_vm10, %v159_v10, %v161_v3 }
 0x100   :  { %v174_v11 = vpop.permute.xlu1 %173  ;;  %v168_v12 = vpop.permute.xlu0 %167 }
 0x101   :  { %v4177_v15 = vsel %vm175_vm11, %v168_v12, %v170_v9  ;;  %v4181_v23 = vsel %vm175_vm11, %v174_v11, %v168_v12 }
 0x102   :  { %v216_v29 = vsel %vm4869_vm3, %v4169_v13, %v4181_v23  ;;  %v217_v30 = vsel %vm4031_vm14, %v4173_v14, %v4177_v15 }
 0x103   :  { %3571 = vmatprep.subr.msk.mxu0 %vm331_vm2, %v217_v30  ;;  %v3577_v30 = vld [vmem:[%s4854_s2 + $0x8] sm:$0xf] }
 0x104   :  { %v295_v40 = vpop.permute.xlu1 %294  ;;  %3572 = vmatpush1.msk.msra.mxu0 %vm331_vm2, %v216_v29  ;;  %v172_v32 = vpop.permute.xlu0 %171 }
 0x105   :  { %v4206_v53 = vsel %vm175_vm11, %v172_v32, %v174_v11  ;;  %v4210_v47 = vsel %vm175_vm11, %v170_v9, %v172_v32  ;;  %3573 = vmatmul.mubr.msk.f32.vlgmr.msra.gmra.mrb[0].mxu0 %vm4867_vm4, %v324_v36 }
 0x106   :  { %v218_v57 = vsel %vm4868_vm5, %v4202_v52, %v4210_v47  ;;  %v219_v59 = vsel %vm4083_vm7, %v4198_v42, %v4206_v53  ;;  %724 = vmatprep.mubr.f32.mxu0 %v3782_v45 }
 0x107   :  { %3574 = vmatprep.subr.msk.mxu1 %vm331_vm2, %v219_v59 }
 0x108   :  { %v299_v49 = vpop.permute.xlu1 %298  ;;  %3575 = vmatpush1.msk.msra.mxu1 %vm331_vm2, %v218_v57  ;;  %v293_v61 = vpop.permute.xlu0 %292 }
 0x109   :  { %3576 = vmatmul.mubr.msk.f32.vlgmr.msra.gmra.mrb[0].mxu1 %vm4867_vm4, %v324_v36  ;;  %v4228_v4 = vsel %vm162_vm10, %v293_v61, %v295_v40  ;;  %v4256_v36 = vsel %vm162_vm10, %v299_v49, %v293_v61 }
 0x10a   :  { %795 = vmatprep.mubr.f32.mxu1 %v3782_v45 }
 0x10c   :  { %v307_v62 = vpop.permute.xlu1 %306  ;;  %v297_v54 = vpop.permute.xlu0 %296 }
 0x10d   :  { %v4232_v9 = vsel %vm162_vm10, %v295_v40, %v297_v54  ;;  %v4261_v32 = vsel %vm162_vm10, %v297_v54, %v299_v49 }
 0x110   :  { %v311_v60 = vpop.permute.xlu1 %310  ;;  %v305_v3 = vpop.permute.xlu0 %304 }
 0x111   :  { %v4236_v10 = vsel %vm175_vm11, %v305_v3, %v307_v62  ;;  %v4240_v11 = vsel %vm175_vm11, %v311_v60, %v305_v3 }
 0x112   :  { %v316_v12 = vsel %vm4869_vm3, %v4228_v4, %v4240_v11  ;;  %v317_v29 = vsel %vm4031_vm14, %v4232_v9, %v4236_v10  ;;  %v321_v19 = vsel %vm4036_vm15, %v4236_v10, %v4232_v9 }
 0x113   :  { %3578 = vmatprep.subr.msk.mxu0 %vm331_vm2, %v317_v29 }
 0x114   :  { %3579 = vmatpush1.msk.msra.mxu0 %vm331_vm2, %v316_v12  ;;  %v309_v40 = vpop.permute.xlu0 %308 }
 0x115   :  { %v312_v57 = vsel %vm175_vm11, %v309_v40, %v311_v60  ;;  %v4267_v59 = vsel %vm175_vm11, %v307_v62, %v309_v40  ;;  %3580 = vmatmul.mubr.msk.f32.vlgmr.msra.gmra.mrb[0].mxu0 %vm4867_vm4, %v3577_v30  ;;  %3585 = vmatprep.subr.msk.mxu0 %vm331_vm2, %v3913_v34  ;;  %v3584_v34 = vld [vmem:[%s4854_s2 + $0xc] sm:$0xf] }
 0x116   :  { %v318_v61 = vsel %vm4868_vm5, %v4261_v32, %v4267_v59  ;;  %3586 = vmatpush1.msk.msra.mxu0 %vm331_vm2, %v3956_v50  ;;  %v319_v49 = vsel %vm4083_vm7, %v4256_v36, %v312_v57  ;;  %887 = vmatprep.mubr.f32.mxu0 %v3782_v45  ;;  %v256_v50 = vsel %vm4887_vm13, %v4181_v23, %v4169_v13 }
 0x117   :  { %3581 = vmatprep.subr.msk.mxu1 %vm331_vm2, %v319_v49  ;;  %3592 = vmatprep.subr.msk.mxu0 %vm331_vm2, %v3843_v8  ;;  %v3591_v8 = vld [vmem:[%s4854_s2 + $0x10] sm:$0xf]  ;;  %v323_v38 = vsel %vm4095_vm9, %v312_v57, %v4256_v36 }
 0x118   :  { %3582 = vmatpush1.msk.msra.mxu1 %vm331_vm2, %v318_v61 }
 0x119   :  { %3583 = vmatmul.mubr.msk.f32.vlgmr.msra.gmra.mrb[0].mxu1 %vm4867_vm4, %v3577_v30  ;;  %3588 = vmatprep.subr.msk.mxu1 %vm331_vm2, %v3962_v51  ;;  %v258_v51 = vsel %vm4888_vm1, %v4210_v47, %v4202_v52  ;;  %vm4889_vm1 = vmmov %vm4887_vm13  ;;  %vm4890_vm13 = vcmp.eq.s32.totalorder %v4021_v21, 1 }
 0x11a   :  { %3589 = vmatpush1.msk.msra.mxu1 %vm331_vm2, %v3990_v63  ;;  %958 = vmatprep.mubr.f32.mxu1 %v3782_v45  ;;  %v3605_v63 = vld [vmem:[%s4854_s2 + $0x18] sm:$0xf]  ;;  %v322_v33 = vsel %vm4890_vm13, %v4267_v59, %v4261_v32 }
 0x11b   :  { %3595 = vmatprep.subr.msk.mxu1 %vm331_vm2, %v3839_v7  ;;  %v3598_v7 = vld [vmem:[%s4854_s2 + $0x14] sm:$0xf] }
 0x11d   :  { %3587 = vmatmul.mubr.msk.f32.vlgmr.msra.gmra.mrb[0].mxu0 %vm4867_vm4, %v3584_v34 }
 0x11e   :  { %3593 = vmatpush1.msk.msra.mxu0 %vm331_vm2, %v3831_v6  ;;  %1046 = vmatprep.mubr.f32.mxu0 %v3782_v45  ;;  %v257_v6 = vsel %vm4036_vm15, %v4177_v15, %v4173_v14 }
 0x11f   :  { %3599 = vmatprep.subr.msk.mxu0 %vm331_vm2, %v4060_v39  ;;  %v3612_v39 = vld [vmem:[%s4854_s2 + $0x1c] sm:$0xf] }
 0x121   :  { %3590 = vmatmul.mubr.msk.f32.vlgmr.msra.gmra.mrb[0].mxu1 %vm4867_vm4, %v3584_v34 }
 0x122   :  { %3596 = vmatpush1.msk.msra.mxu1 %vm331_vm2, %v3829_v5  ;;  %1117 = vmatprep.mubr.f32.mxu1 %v3782_v45  ;;  %v259_v5 = vsel %vm4095_vm9, %v4206_v53, %v4198_v42 }
 0x123   :  { %3602 = vmatprep.subr.msk.mxu1 %vm331_vm2, %v4103_v56 }
 0x125   :  { %3594 = vmatmul.mubr.msk.f32.vlgmr.msra.gmra.mrb[0].mxu0 %vm4867_vm4, %v3591_v8  ;;  %v1784_v56 = vpop.permute.xlu0 %1783 }
 0x126   :  { %3600 = vmatpush1.msk.msra.mxu0 %vm331_vm2, %v4091_v44  ;;  %1209 = vmatprep.mubr.f32.mxu0 %v3782_v45  ;;  %v3619_v44 = vld [vmem:[%s4854_s2 + $0x20] sm:$0xf] }
 0x127   :  { %3606 = vmatprep.subr.msk.mxu0 %vm331_vm2, %v257_v6 }
 0x129   :  { %3597 = vmatmul.mubr.msk.f32.vlgmr.msra.gmra.mrb[0].mxu1 %vm4867_vm4, %v3591_v8 }
 0x12a   :  { %3603 = vmatpush1.msk.msra.mxu1 %vm331_vm2, %v4149_v2  ;;  %1280 = vmatprep.mubr.f32.mxu1 %v3782_v45 }
 0x12b   :  { %3609 = vmatprep.subr.msk.mxu1 %vm331_vm2, %v259_v5 }
 0x12d   :  { %3601 = vmatmul.mubr.msk.f32.vlgmr.msra.gmra.mrb[0].mxu0 %vm4867_vm4, %v3598_v7 }
 0x12e   :  { %3607 = vmatpush1.msk.msra.mxu0 %vm331_vm2, %v256_v50  ;;  %1372 = vmatprep.mubr.f32.mxu0 %v3782_v45 }
 0x12f   :  { %3613 = vmatprep.subr.msk.mxu0 %vm331_vm2, %v289_v41  ;;  %v320_v41 = vsel %vm4889_vm1, %v4240_v11, %v4228_v4 }
 0x131   :  { %3604 = vmatmul.mubr.msk.f32.vlgmr.msra.gmra.mrb[0].mxu1 %vm4867_vm4, %v3598_v7 }
 0x132   :  { %3610 = vmatpush1.msk.msra.mxu1 %vm331_vm2, %v258_v51  ;;  %1443 = vmatprep.mubr.f32.mxu1 %v3782_v45 }
 0x133   :  { %3616 = vmatprep.subr.msk.mxu1 %vm331_vm2, %v291_v0 }
 0x135   :  { %3608 = vmatmul.mubr.msk.f32.vlgmr.msra.gmra.mrb[0].mxu0 %vm4867_vm4, %v3605_v63 }
 0x136   :  { %3614 = vmatpush1.msk.msra.mxu0 %vm331_vm2, %v4115_v58  ;;  %1535 = vmatprep.mubr.f32.mxu0 %v3782_v45 }
 0x137   :  { %3620 = vmatprep.subr.msk.mxu0 %vm331_vm2, %v321_v19 }
 0x139   :  { %3611 = vmatmul.mubr.msk.f32.vlgmr.msra.gmra.mrb[0].mxu1 %vm4867_vm4, %v3605_v63 }
 0x13a   :  { %3617 = vmatpush1.msk.msra.mxu1 %vm331_vm2, %v4121_v46  ;;  %1606 = vmatprep.mubr.f32.mxu1 %v3782_v45 }
 0x13b   :  { %3623 = vmatprep.subr.msk.mxu1 %vm331_vm2, %v323_v38 }
 0x13d   :  { %3615 = vmatmul.mubr.msk.f32.vlgmr.msra.gmra.mrb[0].mxu0 %vm4867_vm4, %v3612_v39 }
 0x13e   :  { %3621 = vmatpush1.msk.msra.mxu0 %vm331_vm2, %v320_v41  ;;  %1698 = vmatprep.mubr.f32.mxu0 %v3782_v45 }
 0x141   :  { %3618 = vmatmul.mubr.msk.f32.vlgmr.msra.gmra.mrb[0].mxu1 %vm4867_vm4, %v3612_v39 }
 0x142   :  { %3624 = vmatpush1.msk.msra.mxu1 %vm331_vm2, %v322_v33  ;;  %1769 = vmatprep.mubr.f32.mxu1 %v3782_v45 }
 0x145   :  { %3622 = vmatmul.mubr.msk.f32.vlgmr.msra.gmra.mrb[0].mxu0 %vm4867_vm4, %v3619_v44 }
 0x146   :  { %2012 = vmatprep.mubr.f32.mxu0 %v3782_v45 }
 0x149   :  { %3625 = vmatmul.mubr.msk.f32.vlgmr.msra.gmra.mrb[0].mxu1 %vm4867_vm4, %v3619_v44 }
 0x14a   :  { %2083 = vmatprep.mubr.f32.mxu1 %v3782_v45 }
 0x218   :  { %v1700_v48 = vpop.f32.mrb[0].mxu0 }
 0x219   :  { %v1786_v58 = vadd.f32 %v1784_v56, %v1700_v48  ;;  %v1702_v46 = vpop.f32.mrb[1].mxu0 }
 0x21a   :  { %v1787_v0 = vadd.f32 %v1784_v56, %v1702_v46 }
 0x21b   :  { %vm1790_vm1 = vcmp.ge.f32.partialorder %v1786_v58, 0.0  ;;  %v1794_v2 = vmul.f32 0.2, %v1786_v58 }
 0x21c   :  { %v1771_v13 = vpop.f32.mrb[0].mxu1  ;;  %v1795_v14 = vmul.f32 0.2, %v1787_v0  ;;  %vm1791_vm13 = vcmp.ge.f32.partialorder %v1787_v0, 0.0 }
 0x21d   :  { %v1788_v15 = vadd.f32 %v1784_v56, %v1771_v13  ;;  %v1773_v23 = vpop.f32.mrb[1].mxu1  ;;  %v4403_v42 = vsel %vm1790_vm1, %v1786_v58, %v1794_v2 }
 0x21e   :  { %v1789_v52 = vadd.f32 %v1784_v56, %v1773_v23  ;;  %1802 = vrot.lane.b32.xlu1 %v4403_v42, %s3778_s28  ;;  %v4407_v47 = vsel %vm1791_vm13, %v1787_v0, %v1795_v14  ;;  %v3626_v23 = vld [vmem:[%s4856_s4 + $0x8] sm:$0xff] }
 0x21f   :  { %vm1792_vm4 = vcmp.ge.f32.partialorder %v1788_v15, 0.0  ;;  %v1796_v53 = vmul.f32 0.2, %v1788_v15 }
 0x220   :  { %v1797_v54 = vmul.f32 0.2, %v1789_v52  ;;  %vm1793_vm5 = vcmp.ge.f32.partialorder %v1789_v52, 0.0 }
 0x221   :  { %v4409_v62 = vsel %vm1792_vm4, %v1788_v15, %v1796_v53  ;;  %vm4891_vm4 = vcmp.lt.s32.totalorder %v3888_v20, 127 }
 0x222   :  { %1806 = vrot.lane.b32.xlu0 %v4409_v62, %s3778_s28  ;;  %1804 = vrot.lane.b32.xlu1 %v4407_v47, %s3778_s28  ;;  %v4415_v60 = vsel %vm1793_vm5, %v1789_v52, %v1797_v54  ;;  %vm4892_vm5 = vcmp.lt.s32.totalorder %v3888_v20, 1  ;;  %vm4893_vm1 = vmmov %vm4891_vm4  ;;  %v3646_v20 = vld [vmem:[%s4856_s4 + $0x18] sm:$0xff] }
 0x223   :  { %vm4894_vm13 = vmmov %vm4893_vm1 }
 0x226   :  { %1814 = vrot.lane.b32.xlu0 %v4403_v42, %s3779_s29  ;;  %1808 = vrot.lane.b32.xlu1 %v4415_v60, %s3778_s28 }
 0x22a   :  { %1818 = vrot.lane.b32.xlu0 %v4409_v62, %s3779_s29  ;;  %1816 = vrot.lane.b32.xlu1 %v4407_v47, %s3779_s29 }
 0x22e   :  { %1866 = vrot.lane.b32.xlu0 %v4403_v42, %s3780_s30  ;;  %1820 = vrot.lane.b32.xlu1 %v4415_v60, %s3779_s29 }
 0x232   :  { %1870 = vrot.lane.b32.xlu0 %v4409_v62, %s3780_s30  ;;  %1868 = vrot.lane.b32.xlu1 %v4407_v47, %s3780_s30 }
 0x236   :  { %1878 = vrot.lane.b32.xlu0 %v4403_v42, %s3781_s8  ;;  %1872 = vrot.lane.b32.xlu1 %v4415_v60, %s3780_s30 }
 0x23a   :  { %1882 = vrot.lane.b32.xlu0 %v4409_v62, %s3781_s8  ;;  %1880 = vrot.lane.b32.xlu1 %v4407_v47, %s3781_s8 }
 0x23e   :  { %1884 = vrot.lane.b32.xlu1 %v4415_v60, %s3781_s8 }
 0x290   :  { %v1803_v3 = vpop.permute.xlu1 %1802 }
 0x294   :  { %v1807_v4 = vpop.permute.xlu0 %1806  ;;  %v1805_v9 = vpop.permute.xlu1 %1804 }
 0x295   :  { %v1811_v30 = vsel %vm4891_vm4, %v1805_v9, %v1807_v4  ;;  %v1812_v59 = vsel %vm4893_vm1, %v1803_v3, %v1805_v9  ;;  %vm4895_vm4 = vmmov %vm4892_vm5 }
 0x296   :  { %vm4898_vm3 = vmmov %vm4895_vm4 }
 0x298   :  { %v1815_v10 = vpop.permute.xlu0 %1814  ;;  %v1809_v11 = vpop.permute.xlu1 %1808 }
 0x299   :  { %v1813_v61 = vsel %vm4894_vm13, %v1809_v11, %v1803_v3  ;;  %vm4899_vm13 = vcmp.eq.s32.totalorder %v3916_v35, 1 }
 0x29c   :  { %v1819_v12 = vpop.permute.xlu0 %1818  ;;  %v1817_v29 = vpop.permute.xlu1 %1816 }
 0x29d   :  { %v1824_v36 = vsel %vm4892_vm5, %v1815_v10, %v1817_v29  ;;  %vm4896_vm5 = vmmov %vm4895_vm4  ;;  %v1823_v6 = vsel %vm4898_vm3, %v1817_v29, %v1819_v12  ;;  %vm4902_vm3 = vcmp.eq.s32.totalorder %v4012_v17, 1 }
 0x29e   :  { %v4449_v40 = vsel %vm3897_vm6, %v1811_v30, %v1824_v36  ;;  %vm4897_vm6 = vcmp.eq.s32.totalorder %v3894_v26, 1  ;;  %v1810_v26 = vsel %vm4893_vm1, %v1807_v4, %v1809_v11  ;;  %v4507_v44 = vsel %vm4015_vm12, %v1824_v36, %v1811_v30 }
 0x29f   :  { %1836 = vrot.lane.b32.xlu1 %v4449_v40, %s3780_s30  ;;  %v4479_v50 = vsel %vm4899_vm13, %v1810_v26, %v1823_v6  ;;  %vm4901_vm12 = vcmp.eq.s32.totalorder %v3992_v1, 1  ;;  %vm4908_vm13 = vmmov %vm4902_vm3 }
 0x2a0   :  { %v1867_v32 = vpop.permute.xlu0 %1866  ;;  %v1821_v57 = vpop.permute.xlu1 %1820 }
 0x2a1   :  { %v1822_v49 = vsel %vm4895_vm4, %v1819_v12, %v1821_v57  ;;  %v1825_v34 = vsel %vm4896_vm5, %v1821_v57, %v1815_v10  ;;  %vm4904_vm4 = vcmp.eq.s32.totalorder %v4047_v31, 1  ;;  %vm4905_vm5 = vcmask 31744   ;;  %v3653_v31 = vld [vmem:[%s4856_s4 + $0x20] sm:$0xff] }
 0x2a2   :  { %v4463_v28 = vsel %vm4897_vm6, %v1812_v59, %v1825_v34  ;;  %v4467_v8 = vsel %vm3921_vm8, %v1813_v61, %v1822_v49  ;;  %vm4900_vm8 = vcmp.eq.s32.totalorder %v4021_v21, 1  ;;  %v4524_v58 = vsel %vm4901_vm12, %v1825_v34, %v1812_v59  ;;  %vm4907_vm1 = vmmov %vm4905_vm5 }
 0x2a3   :  { %1834 = vrot.lane.b32.xlu0 %v4463_v28, %s3780_s30  ;;  %1840 = vrot.lane.b32.xlu1 %v4467_v8, %s3780_s30  ;;  %v4528_v46 = vsel %vm4040_vm0, %v1822_v49, %v1813_v61  ;;  %vm4903_vm0 = vcmp.eq.s32.totalorder %v4009_v16, 1  ;;  %vm4906_vm6 = vcmp.eq.s32.totalorder %v4044_v27, 1  ;;  %v3388_v27 = vld [vmem:[%s4857_s5] sm:$0xff]  ;;  %vm4910_vm12 = vmmov %vm4904_vm4 }
 0x2a4   :  { %v1871_v5 = vpop.permute.xlu0 %1870  ;;  %v1869_v7 = vpop.permute.xlu1 %1868  ;;  %v4571_v54 = vsel %vm4906_vm6, %v1823_v6, %v1810_v26  ;;  %v1930_v49 = vld [vmem:[%s4856_s4] sm:$0xff]  ;;  %vm4918_vm6 = vmmov %vm4907_vm1 }
 0x2a5   :  { %v4491_v35 = vsel %vm162_vm10, %v1869_v7, %v1871_v5  ;;  %v1876_v0 = vsel %vm162_vm10, %v1867_v32, %v1869_v7 }
 0x2a7   :  { %1838 = vrot.lane.b32.xlu0 %v4479_v50, %s3780_s30  ;;  %1848 = vrot.lane.b32.xlu1 %v4449_v40, %s3781_s8 }
 0x2a8   :  { %v1879_v37 = vpop.permute.xlu0 %1878  ;;  %v1873_v51 = vpop.permute.xlu1 %1872 }
 0x2a9   :  { %v1874_v38 = vsel %vm162_vm10, %v1871_v5, %v1873_v51  ;;  %v4534_v2 = vsel %vm162_vm10, %v1873_v51, %v1867_v32 }
 0x2ab   :  { %1846 = vrot.lane.b32.xlu0 %v4463_v28, %s3781_s8  ;;  %1852 = vrot.lane.b32.xlu1 %v4467_v8, %s3781_s8 }
 0x2ac   :  { %v1883_v63 = vpop.permute.xlu0 %1882  ;;  %v1881_v19 = vpop.permute.xlu1 %1880 }
 0x2ad   :  { %v1887_v39 = vsel %vm175_vm11, %v1881_v19, %v1883_v63  ;;  %v4499_v41 = vsel %vm175_vm11, %v1879_v37, %v1881_v19 }
 0x2ae   :  { %v4503_v33 = vsel %vm4900_vm8, %v1887_v39, %v1874_v38  ;;  %v1891_v56 = vsel %vm4031_vm14, %v4491_v35, %v4499_v41  ;;  %v1895_v48 = vsel %vm4036_vm15, %v4499_v41, %v4491_v35  ;;  %v1892_v53 = vsel %vm4904_vm4, %v1874_v38, %v1887_v39  ;;  %vm4909_vm8 = vmmov %vm4907_vm1 }
 0x2af   :  { %1850 = vrot.lane.b32.xlu0 %v4479_v50, %s3781_s8  ;;  %1900 = vrot.lane.b32.xlu1 %v4507_v44, %s3780_s30  ;;  %v3401_v35 = vcombine.high %v3775_v24, %v3775_v24 }
 0x2b0   :  { %3627 = vmatprep.subr.msk.mxu0 %vm331_vm2, %v1891_v56  ;;  %v1885_v18 = vpop.permute.xlu1 %1884 }
 0x2b1   :  { %v4538_v13 = vsel %vm175_vm11, %v1883_v63, %v1885_v18  ;;  %v1889_v1 = vsel %vm175_vm11, %v1885_v18, %v1879_v37 }
 0x2b2   :  { %v1890_v14 = vsel %vm4902_vm3, %v1876_v0, %v1889_v1  ;;  %v4546_v25 = vsel %vm4903_vm0, %v1889_v1, %v1876_v0  ;;  %v1893_v15 = vsel %vm4083_vm7, %v4534_v2, %v4538_v13  ;;  %v1897_v52 = vsel %vm4095_vm9, %v4538_v13, %v4534_v2  ;;  %vm4911_vm3 = vmmov %vm4907_vm1 }
 0x2b3   :  { %1898 = vrot.lane.b32.xlu0 %v4524_v58, %s3780_s30  ;;  %1904 = vrot.lane.b32.xlu1 %v4528_v46, %s3780_s30  ;;  %vm4912_vm0 = vmmov %vm4908_vm13 }
 0x2b4   :  { %3628 = vmatpush1.msk.msra.mxu0 %vm331_vm2, %v1890_v14  ;;  %3630 = vmatprep.subr.msk.mxu1 %vm331_vm2, %v1893_v15 }
 0x2b5   :  { %3631 = vmatpush1.msk.msra.mxu1 %vm331_vm2, %v1892_v53  ;;  %3629 = vmatmul.mubr.msk.f32.vlgmr.msra.gmra.mrb[2].mxu0 %vm4905_vm5, %v3626_v23  ;;  %vm4917_vm5 = vmmov %vm4907_vm1 }
 0x2b6   :  { %3632 = vmatmul.mubr.msk.f32.vlgmr.msra.gmra.mrb[2].mxu1 %vm4907_vm1, %v3626_v23  ;;  %2169 = vmatprep.mubr.f32.mxu0 %v3782_v45 }
 0x2b7   :  { %1902 = vrot.lane.b32.xlu0 %v4571_v54, %s3780_s30  ;;  %1912 = vrot.lane.b32.xlu1 %v4507_v44, %s3781_s8 }
 0x2b8   :  { %2240 = vmatprep.mubr.f32.mxu1 %v3782_v45 }
 0x2bb   :  { %1910 = vrot.lane.b32.xlu0 %v4524_v58, %s3781_s8  ;;  %1916 = vrot.lane.b32.xlu1 %v4528_v46, %s3781_s8 }
 0x2bf   :  { %1914 = vrot.lane.b32.xlu0 %v4571_v54, %s3781_s8 }
 0x2c3   :  { %3391 = vperm.xlu0 %3772, %v3388_v27  }
 0x311   :  { %v1837_v3 = vpop.permute.xlu1 %1836 }
 0x315   :  { %v1835_v4 = vpop.permute.xlu0 %1834  ;;  %v1841_v9 = vpop.permute.xlu1 %1840 }
 0x316   :  { %v4591_v30 = vsel %vm162_vm10, %v1835_v4, %v1837_v3  ;;  %v4620_v5 = vsel %vm162_vm10, %v1841_v9, %v1835_v4 }
 0x319   :  { %v1839_v10 = vpop.permute.xlu0 %1838  ;;  %v1849_v11 = vpop.permute.xlu1 %1848 }
 0x31a   :  { %v4595_v36 = vsel %vm162_vm10, %v1837_v3, %v1839_v10  ;;  %v4624_v7 = vsel %vm162_vm10, %v1839_v10, %v1841_v9  ;;  %v3639_v3 = vld [vmem:[%s4856_s4 + $0x10] sm:$0xff] }
 0x31d   :  { %v1847_v12 = vpop.permute.xlu0 %1846  ;;  %v1853_v29 = vpop.permute.xlu1 %1852 }
 0x31e   :  { %v4599_v32 = vsel %vm175_vm11, %v1847_v12, %v1849_v11  ;;  %v4603_v57 = vsel %vm175_vm11, %v1853_v29, %v1847_v12 }
 0x31f   :  { %v1858_v59 = vsel %vm4908_vm13, %v4591_v30, %v4603_v57  ;;  %v1859_v61 = vsel %vm4031_vm14, %v4595_v36, %v4599_v32  ;;  %v1863_v43 = vsel %vm4036_vm15, %v4599_v32, %v4595_v36  ;;  %vm4920_vm13 = vmmov %vm4911_vm3 }
 0x320   :  { %3633 = vmatprep.subr.msk.mxu0 %vm331_vm2, %v1859_v61 }
 0x321   :  { %v1851_v34 = vpop.permute.xlu0 %1850  ;;  %3634 = vmatpush1.msk.msra.mxu0 %vm331_vm2, %v1858_v59  ;;  %v1901_v6 = vpop.permute.xlu1 %1900 }
 0x322   :  { %v4628_v26 = vsel %vm175_vm11, %v1851_v34, %v1853_v29  ;;  %v4632_v37 = vsel %vm175_vm11, %v1849_v11, %v1851_v34  ;;  %3635 = vmatmul.mubr.msk.f32.vlgmr.msra.gmra.mrb[2].mxu0 %vm4909_vm8, %v1930_v49  ;;  %vm4921_vm8 = vcmp.eq.s32.totalorder %v4021_v21, 1  ;;  %v3398_v21 = vld [vmem:[%s4858_s6] sm:$0xff] }
 0x323   :  { %v1860_v51 = vsel %vm4910_vm12, %v4624_v7, %v4632_v37  ;;  %v1861_v63 = vsel %vm4083_vm7, %v4620_v5, %v4628_v26  ;;  %2328 = vmatprep.mubr.f32.mxu0 %v3782_v45  ;;  %vm4922_vm12 = vmmov %vm4911_vm3 }
 0x324   :  { %3636 = vmatprep.subr.msk.mxu1 %vm331_vm2, %v1861_v63 }
 0x325   :  { %v1899_v19 = vpop.permute.xlu0 %1898  ;;  %3637 = vmatpush1.msk.msra.mxu1 %vm331_vm2, %v1860_v51  ;;  %v1905_v38 = vpop.permute.xlu1 %1904 }
 0x326   :  { %3638 = vmatmul.mubr.msk.f32.vlgmr.msra.gmra.mrb[2].mxu1 %vm4911_vm3, %v1930_v49  ;;  %v4650_v1 = vsel %vm162_vm10, %v1899_v19, %v1901_v6  ;;  %v4678_v4 = vsel %vm162_vm10, %v1905_v38, %v1899_v19 }
 0x327   :  { %2399 = vmatprep.mubr.f32.mxu1 %v3782_v45 }
 0x329   :  { %v1903_v39 = vpop.permute.xlu0 %1902  ;;  %v1913_v56 = vpop.permute.xlu1 %1912 }
 0x32a   :  { %v4654_v14 = vsel %vm162_vm10, %v1901_v6, %v1903_v39  ;;  %v4683_v17 = vsel %vm162_vm10, %v1903_v39, %v1905_v38  ;;  %vm4914_vm10 = vmmov %vm4907_vm1 }
 0x32d   :  { %v1911_v18 = vpop.permute.xlu0 %1910  ;;  %v1917_v0 = vpop.permute.xlu1 %1916 }
 0x32e   :  { %v4658_v15 = vsel %vm175_vm11, %v1911_v18, %v1913_v56  ;;  %v4662_v23 = vsel %vm175_vm11, %v1917_v0, %v1911_v18 }
 0x32f   :  { %v1922_v53 = vsel %vm4912_vm0, %v4650_v1, %v4662_v23  ;;  %v1923_v27 = vsel %vm4031_vm14, %v4654_v14, %v4658_v15  ;;  %vm4913_vm14 = vmmov %vm4907_vm1 }
 0x330   :  { %3640 = vmatprep.subr.msk.mxu0 %vm331_vm2, %v1923_v27  ;;  %vm4923_vm0 = vmmov %vm4911_vm3 }
 0x331   :  { %v1915_v9 = vpop.permute.xlu0 %1914  ;;  %3641 = vmatpush1.msk.msra.mxu0 %vm331_vm2, %v1922_v53 }
 0x332   :  { %v1918_v22 = vsel %vm175_vm11, %v1915_v9, %v1917_v0  ;;  %v4689_v10 = vsel %vm175_vm11, %v1913_v56, %v1915_v9  ;;  %3642 = vmatmul.mubr.msk.f32.vlgmr.msra.gmra.mrb[2].mxu0 %vm4913_vm14, %v3639_v3  ;;  %3647 = vmatprep.subr.msk.mxu0 %vm331_vm2, %v4449_v40  ;;  %vm4916_vm11 = vmmov %vm4907_vm1  ;;  %v3667_v40 = vld [vmem:[%s4856_s4 + $0x30] sm:$0xff] }
 0x333   :  { %v1924_v11 = vsel %vm4904_vm4, %v4683_v17, %v4689_v10  ;;  %3648 = vmatpush1.msk.msra.mxu0 %vm331_vm2, %v4463_v28  ;;  %v1925_v12 = vsel %vm4083_vm7, %v4678_v4, %v1918_v22  ;;  %2491 = vmatprep.mubr.f32.mxu0 %v3782_v45  ;;  %vm4915_vm7 = vmmov %vm4907_vm1  ;;  %vm4919_vm1 = vcmp.eq.s32.totalorder %v4009_v16, 1  ;;  %v1927_v28 = vsel %vm4036_vm15, %v4658_v15, %v4654_v14  ;;  %v3681_v16 = vld [vmem:[%s4856_s4 + $0x40] sm:$0xff] }
 0x334   :  { %3643 = vmatprep.subr.msk.mxu1 %vm331_vm2, %v1925_v12  ;;  %3654 = vmatprep.subr.msk.mxu0 %vm331_vm2, %v4407_v47  ;;  %v3660_v47 = vld [vmem:[%s4856_s4 + $0x28] sm:$0xff]  ;;  %vm4924_vm15 = vmmov %vm4919_vm1 }
 0x335   :  { %3644 = vmatpush1.msk.msra.mxu1 %vm331_vm2, %v1924_v11  ;;  %v1926_v41 = vsel %vm4924_vm15, %v4662_v23, %v4650_v1  ;;  %vm4925_vm14 = vmmov %vm4923_vm0 }
 0x336   :  { %3645 = vmatmul.mubr.msk.f32.vlgmr.msra.gmra.mrb[2].mxu1 %vm4914_vm10, %v3639_v3  ;;  %3650 = vmatprep.subr.msk.mxu1 %vm331_vm2, %v4467_v8  ;;  %v1929_v8 = vsel %vm4095_vm9, %v1918_v22, %v4678_v4  ;;  %vm4927_vm4 = vmmov %vm4923_vm0 }
 0x337   :  { %3651 = vmatpush1.msk.msra.mxu1 %vm331_vm2, %v4479_v50  ;;  %2562 = vmatprep.mubr.f32.mxu1 %v3782_v45  ;;  %v3674_v50 = vld [vmem:[%s4856_s4 + $0x38] sm:$0xff]  ;;  %vm4928_vm10 = vmmov %vm4923_vm0 }
 0x338   :  { %3657 = vmatprep.subr.msk.mxu1 %vm331_vm2, %v4415_v60  ;;  %v1864_v60 = vsel %vm4921_vm8, %v4632_v37, %v4624_v7 }
 0x33a   :  { %3649 = vmatmul.mubr.msk.f32.vlgmr.msra.gmra.mrb[2].mxu0 %vm4915_vm7, %v3646_v20  ;;  %vm4929_vm7 = vmmov %vm4923_vm0 }
 0x33b   :  { %3655 = vmatpush1.msk.msra.mxu0 %vm331_vm2, %v4403_v42  ;;  %2654 = vmatprep.mubr.f32.mxu0 %v3782_v45  ;;  %v1865_v42 = vsel %vm4095_vm9, %v4628_v26, %v4620_v5  ;;  %vm4926_vm9 = vmmov %vm4921_vm8 }
 0x33c   :  { %3661 = vmatprep.subr.msk.mxu0 %vm331_vm2, %v4507_v44  ;;  %v1928_v44 = vsel %vm4926_vm9, %v4689_v10, %v4683_v17 }
 0x33e   :  { %3652 = vmatmul.mubr.msk.f32.vlgmr.msra.gmra.mrb[2].mxu1 %vm4916_vm11, %v3646_v20  ;;  %vm4930_vm11 = vmmov %vm4923_vm0 }
 0x33f   :  { %3658 = vmatpush1.msk.msra.mxu1 %vm331_vm2, %v4409_v62  ;;  %2725 = vmatprep.mubr.f32.mxu1 %v3782_v45  ;;  %v1862_v62 = vsel %vm4919_vm1, %v4603_v57, %v4591_v30 }
 0x340   :  { %3664 = vmatprep.subr.msk.mxu1 %vm331_vm2, %v4528_v46 }
 0x342   :  { %3656 = vmatmul.mubr.msk.f32.vlgmr.msra.gmra.mrb[2].mxu0 %vm4917_vm5, %v3653_v31  ;;  %vm4931_vm5 = vmmov %vm4923_vm0 }
 0x343   :  { %3662 = vmatpush1.msk.msra.mxu0 %vm331_vm2, %v4524_v58  ;;  %2817 = vmatprep.mubr.f32.mxu0 %v3782_v45 }
 0x344   :  { %3668 = vmatprep.subr.msk.mxu0 %vm331_vm2, %v1863_v43 }
 0x346   :  { %3659 = vmatmul.mubr.msk.f32.vlgmr.msra.gmra.mrb[2].mxu1 %vm4918_vm6, %v3653_v31 }
 0x347   :  { %3665 = vmatpush1.msk.msra.mxu1 %vm331_vm2, %v4571_v54  ;;  %2888 = vmatprep.mubr.f32.mxu1 %v3782_v45 }
 0x348   :  { %3671 = vmatprep.subr.msk.mxu1 %vm331_vm2, %v1865_v42 }
 0x34a   :  { %3663 = vmatmul.mubr.msk.f32.vlgmr.msra.gmra.mrb[2].mxu0 %vm4920_vm13, %v3660_v47 }
 0x34b   :  { %3669 = vmatpush1.msk.msra.mxu0 %vm331_vm2, %v1862_v62  ;;  %2980 = vmatprep.mubr.f32.mxu0 %v3782_v45 }
 0x34c   :  { %3675 = vmatprep.subr.msk.mxu0 %vm331_vm2, %v1895_v48  ;;  %v3392_v48 = vpop.permute.xlu0 %3391 }
 0x34e   :  { %3666 = vmatmul.mubr.msk.f32.vlgmr.msra.gmra.mrb[2].mxu1 %vm4922_vm12, %v3660_v47 }
 0x34f   :  { %3672 = vmatpush1.msk.msra.mxu1 %vm331_vm2, %v1864_v60  ;;  %3051 = vmatprep.mubr.f32.mxu1 %v3782_v45 }
 0x350   :  { %3678 = vmatprep.subr.msk.mxu1 %vm331_vm2, %v1897_v52 }
 0x352   :  { %3670 = vmatmul.mubr.msk.f32.vlgmr.msra.gmra.mrb[2].mxu0 %vm4911_vm3, %v3667_v40 }
 0x353   :  { %3676 = vmatpush1.msk.msra.mxu0 %vm331_vm2, %v4546_v25  ;;  %3143 = vmatprep.mubr.f32.mxu0 %v3782_v45 }
 0x354   :  { %3682 = vmatprep.subr.msk.mxu0 %vm331_vm2, %v1927_v28 }
 0x356   :  { %3673 = vmatmul.mubr.msk.f32.vlgmr.msra.gmra.mrb[2].mxu1 %vm4923_vm0, %v3667_v40 }
 0x357   :  { %3679 = vmatpush1.msk.msra.mxu1 %vm331_vm2, %v4503_v33  ;;  %3214 = vmatprep.mubr.f32.mxu1 %v3782_v45  ;;  %v3402_v33 = vcombine.high %v3776_v55, %v3776_v55 }
 0x358   :  { %3685 = vmatprep.subr.msk.mxu1 %vm331_vm2, %v1929_v8 }
 0x35a   :  { %3677 = vmatmul.mubr.msk.f32.vlgmr.msra.gmra.mrb[2].mxu0 %vm4925_vm14, %v3674_v50 }
 0x35b   :  { %3683 = vmatpush1.msk.msra.mxu0 %vm331_vm2, %v1926_v41  ;;  %3306 = vmatprep.mubr.f32.mxu0 %v3782_v45 }
 0x35c   :  { %3688 = vmatprep.subr.msk.mxu0 %vm331_vm2, %v3401_v35 }
 0x35e   :  { %3680 = vmatmul.mubr.msk.f32.vlgmr.msra.gmra.mrb[2].mxu1 %vm4927_vm4, %v3674_v50 }
 0x35f   :  { %3686 = vmatpush1.msk.msra.mxu1 %vm331_vm2, %v1928_v44  ;;  %3377 = vmatprep.mubr.f32.mxu1 %v3782_v45 }
 0x360   :  { %3691 = vmatprep.subr.msk.mxu1 %vm331_vm2, %v3402_v33 }
 0x362   :  { %3684 = vmatmul.mubr.msk.f32.vlgmr.msra.gmra.mrb[2].mxu0 %vm4928_vm10, %v3681_v16 }
 0x363   :  { %3689 = vmatpush1.msk.msra.mxu0 %vm331_vm2, %v3775_v24  ;;  %3478 = vmatprep.mubr.f32.mxu0 %v3782_v45 }
 0x366   :  { %3687 = vmatmul.mubr.msk.f32.vlgmr.msra.gmra.mrb[2].mxu1 %vm4929_vm7, %v3681_v16 }
 0x367   :  { %3692 = vmatpush1.msk.msra.mxu1 %vm331_vm2, %v3776_v55  ;;  %3549 = vmatprep.mubr.f32.mxu1 %v3782_v45 }
 0x36a   :  { %3690 = vmatmul.mubr.msk.f32.vlgmr.msra.gmra.mrb[2].mxu0 %vm4930_vm11, %v3398_v21 }
 0x36e   :  { %3693 = vmatmul.mubr.msk.f32.vlgmr.msra.gmra.mrb[2].mxu1 %vm4931_vm5, %v3398_v21 }
 0x43d   :  { %v3480_v58 = vpop.f32.mrb[2].mxu0 }
 0x43e   :  { %v3694_v46 = vadd.f32 %v3480_v58, %v3392_v48  ;;  %v3482_v2 = vpop.f32.mrb[3].mxu0 }
 0x43f   :  { %v3695_v13 = vadd.f32 %v3482_v2, %v3392_v48 }
 0x440   :  { %3556 = vst [vmem:[%s4859_s7] sm:$0xff] %v3694_v46 }
 0x441   :  { %3557 = vst [vmem:[%s4859_s7 + $0x8] sm:$0xff] %v3695_v13  ;;  %v3551_v25 = vpop.f32.mrb[2].mxu1 }
 0x442   :  { %v3696_v52 = vadd.f32 %v3551_v25, %v3392_v48  ;;  %v3553_v45 = vpop.f32.mrb[3].mxu1 }
 0x443   :  { %v3697_v54 = vadd.f32 %v3553_v45, %v3392_v48 }
 0x444   :  { %3558 = vst [vmem:[%s4859_s7 + $0x10] sm:$0xff] %v3696_v52 }
 0x445   :  { %3559 = vst [vmem:[%s4859_s7 + $0x18] sm:$0xff] %v3697_v54 }

</bundles_post_ra>
